<compile_context>
chip_gen: v7x
topology: tpu7x:2x2x1
jax: 0.10.0
libtpu: 0.0.40
codegen_flags: <defaults>
</compile_context>

<pallas_src>
import functools
from typing import NamedTuple, Tuple

import jax
import jax.numpy as jnp
from jax.experimental import pallas as pl
from jax.experimental.pallas import tpu as pltpu

LANE = 128
NEG_INF = -1e9          # finite "minus infinity" for padded logit lanes (avoids 0*inf)
TOKEN_TILE = 1024       # token-axis tile, used only when N is large (v7x megacore)


# -----------------------------------------------------------------------------
# Static metadata describing the packed wide-weight slab (hashable -> jit-static)
# -----------------------------------------------------------------------------
class FusedMeta(NamedTuple):
    layers: Tuple[Tuple[int, int, int, bool], ...]  # (row_off, d_in, d_out, relu)
    bias_row: int            # bias of wide layer l lives at pack[bias_row + l, :d_out]
    n_trunk: int             # trunk layers (shallow experts || critic hidden nets)
    n_deep_hidden: int       # deep hidden wide layers before the combined final
    K: int                   # number of actor experts (laac_size)
    n_nets: int              # number of critic nets
    h_shallow: int           # per-expert shallow output width
    h_critic: int            # per-net critic hidden width
    act_dim: int
    a_pad: int               # per-expert padded logit width inside the combined final
    v_pad: int               # per-net padded value width inside the combined final


def _round_up(x, m):
    return (x + m - 1) // m * m


def _block_diag(blocks):
    r = sum(b.shape[0] for b in blocks)
    c = sum(b.shape[1] for b in blocks)
    out = jnp.zeros((r, c), jnp.float32)
    ro = co = 0
    for b in blocks:
        out = out.at[ro:ro + b.shape[0], co:co + b.shape[1]].set(b)
        ro += b.shape[0]
        co += b.shape[1]
    return out


# -----------------------------------------------------------------------------
# Host-side packing: per-expert stacks -> wide matmuls -> one lane-padded slab.
# -----------------------------------------------------------------------------
def build_fused_policy(params, act_dim):
    sw, sb = params["shallow_w"], params["shallow_b"]
    dw, db = params["deep_w"], params["deep_b"]
    cw, cb = params["critic_w"], params["critic_b"]

    K = sw[0].shape[0]
    n_nets = cw[0].shape[0]
    S, D, C = len(sw), len(dw), len(cw)
    assert C == S + 1, "trunk fusion expects len(critic) == len(shallow) + 1"
    assert sw[0].shape[1] == cw[0].shape[1], "actor/critic input widths must match"
    assert dw[0].shape[1] == sw[-1].shape[2], "shallow_dims[-1] must equal deep_dims[0]"
    assert dw[-1].shape[2] == act_dim and cw[-1].shape[2] == 1
    assert act_dim <= LANE

    h_shallow = sw[-1].shape[2]
    h_critic = cw[C - 2].shape[2]
    a_pad = 64 if act_dim <= 64 else LANE
    v_pad = 64

    def bvec(b):                       # (1, d) -> (d,)
        return jnp.reshape(b, (-1,))

    wide_w, wide_b, relu_flags = [], [], []

    # --- trunk: shallow experts || critic hidden nets (ReLU after every layer) ---
    for i in range(S):
        blocks_w = [sw[i][k] for k in range(K)] + [cw[i][k] for k in range(n_nets)]
        blocks_b = [bvec(sb[i][k]) for k in range(K)] + [bvec(cb[i][k]) for k in range(n_nets)]
        W = jnp.concatenate(blocks_w, axis=1) if i == 0 else _block_diag(blocks_w)
        wide_w.append(W)
        wide_b.append(jnp.concatenate(blocks_b, axis=0))
        relu_flags.append(True)

    # --- deep hidden layers, wide over the K experts (ReLU between layers) -------
    for j in range(D - 1):
        blocks_w = [dw[j][k] for k in range(K)]
        blocks_b = [bvec(db[j][k]) for k in range(K)]
        W = jnp.concatenate(blocks_w, axis=1) if j == 0 else _block_diag(blocks_w)
        wide_w.append(W)
        wide_b.append(jnp.concatenate(blocks_b, axis=0))
        relu_flags.append(True)

    # --- combined final: deep final (per-expert, NEG_INF padded lanes) and
    #     critic final (per-net, value in lane 0) in ONE block matrix --------------
    a_blocks, a_bias = [], []
    for k in range(K):
        blk = jnp.zeros((dw[-1].shape[1], a_pad), jnp.float32).at[:, :act_dim].set(dw[-1][k])
        a_blocks.append(blk)
        a_bias.append(jnp.full((a_pad,), NEG_INF, jnp.float32).at[:act_dim].set(bvec(db[-1][k])))
    actor_fin = _block_diag(a_blocks) if D >= 2 else jnp.concatenate(a_blocks, axis=1)

    c_blocks, c_bias = [], []
    for k in range(n_nets):
        blk = jnp.zeros((cw[-1].shape[1], v_pad), jnp.float32).at[:, :1].set(cw[-1][k])
        c_blocks.append(blk)
        c_bias.append(jnp.zeros((v_pad,), jnp.float32).at[:1].set(bvec(cb[-1][k])))
    critic_fin = _block_diag(c_blocks)

    wide_w.append(_block_diag([actor_fin, critic_fin]))
    wide_b.append(jnp.concatenate(a_bias + c_bias, axis=0))
    relu_flags.append(False)

    # --- pack everything into one lane-padded slab + static metadata --------------
    CW = _round_up(max(w.shape[1] for w in wide_w), LANE)
    layers_meta, row = [], 0
    for w, rl in zip(wide_w, relu_flags):
        layers_meta.append((int(row), int(w.shape[0]), int(w.shape[1]), bool(rl)))
        row += _round_up(int(w.shape[0]), 8)
    bias_row = int(row)
    total_rows = bias_row + _round_up(len(wide_w), 8)

    pack = jnp.zeros((total_rows, CW), jnp.float32)
    for (r0, din, dout, _), w in zip(layers_meta, wide_w):
        pack = pack.at[r0:r0 + din, :dout].set(w)
    for l, b in enumerate(wide_b):
        pack = pack.at[bias_row + l, :b.shape[0]].set(b)

    meta = FusedMeta(
        layers=tuple(layers_meta), bias_row=bias_row,
        n_trunk=S, n_deep_hidden=D - 1,
        K=int(K), n_nets=int(n_nets),
        h_shallow=int(h_shallow), h_critic=int(h_critic),
        act_dim=int(act_dim), a_pad=int(a_pad), v_pad=int(v_pad))
    return pack, meta


# -----------------------------------------------------------------------------
# The single fused kernel: trunk -> shallow select -> deep hidden ->
# combined final (logits + value) -> deep/critic select -> softmax epilogue.
# -----------------------------------------------------------------------------
def _make_fused_kernel(meta: FusedMeta):
    layers, bias_row = meta.layers, meta.bias_row
    n_trunk, n_deep = meta.n_trunk, meta.n_deep_hidden
    K, n_nets = meta.K, meta.n_nets
    hs, hc = meta.h_shallow, meta.h_critic
    a_pad, v_pad = meta.a_pad, meta.v_pad

    def kernel(x_ref, laac_ref, pack_ref, out_ref):
        x = x_ref[...]                                  # (N, Din) f32
        laac_sh = laac_ref[:, 0:1]                      # (N, 1) int32
        laac_dp = laac_ref[:, 1:2]
        N = x.shape[0]

        def dense(h, l):
            row, din, dout, relu = layers[l]
            w = pack_ref[row:row + din, 0:dout]
            b = pack_ref[bias_row + l:bias_row + l + 1, 0:dout]
            y = jnp.dot(h, w, preferred_element_type=jnp.float32) + b
            return jnp.maximum(y, 0.0) if relu else y

        # ---- fused trunk: [shallow expert 0..K-1 | critic net 0..n_nets-1] ----
        h = x
        for l in range(n_trunk):
            h = dense(h, l)
        c_hid = h[:, K * hs:K * hs + n_nets * hc]        # critic hidden block

        # per-token shallow-expert select (integer compare -> VPU mask)
        h_sel = None
        for k in range(K):
            m = (laac_sh == k).astype(jnp.float32)       # (N, 1)
            part = h[:, k * hs:(k + 1) * hs] * m
            h_sel = part if h_sel is None else h_sel + part

        # ---- deep hidden layers, wide over the K experts ----------------------
        g = h_sel
        for j in range(n_deep):
            g = dense(g, n_trunk + j)

        # ---- combined final: one MXU pass -> per-expert logits + per-net value -
        fin_in = jnp.concatenate([g, c_hid], axis=-1)
        f = dense(fin_in, n_trunk + n_deep)              # (N, K*a_pad + n_nets*v_pad)

        mdp = [(laac_dp == k).astype(jnp.float32) for k in range(max(K, n_nets))]
        logits = None
        for k in range(K):
            la = f[:, k * a_pad:(k + 1) * a_pad] * mdp[k]
            logits = la if logits is None else logits + la
        value = None
        for k in range(n_nets):
            lv = f[:, K * a_pad + k * v_pad:K * a_pad + (k + 1) * v_pad] * mdp[k]
            value = lv if value is None else value + lv

        if a_pad < LANE:
            logits = jnp.concatenate(
                [logits, jnp.full((N, LANE - a_pad), NEG_INF, jnp.float32)], axis=-1)
        if v_pad < LANE:
            value = jnp.concatenate(
                [value, jnp.zeros((N, LANE - v_pad), jnp.float32)], axis=-1)

        # ---- softmax epilogue (exact reciprocal: probs feed downstream math) ---
        mx = jnp.max(logits, axis=-1, keepdims=True)
        e = jnp.exp(logits - mx)                         # padded lanes -> exp(-1e9) == 0
        probs = e * pl.reciprocal(jnp.sum(e, axis=-1, keepdims=True))

        out_ref[:, 0:LANE] = logits
        out_ref[:, LANE:2 * LANE] = probs
        out_ref[:, 2 * LANE:3 * LANE] = value

    return kernel


def fused_policy_apply(x, laac, pack, meta):
    """One pallas_call for the whole Policy forward (actor + critic)."""
    N, Din = x.shape
    kernel = _make_fused_kernel(meta)
    out_shape = jax.ShapeDtypeStruct((N, 3 * LANE), jnp.float32)

    # Tile the token axis only when it is large enough to matter (lets v7x's two
    # TensorCores split the work).  At small N a single grid step is optimal.
    if N >= 2 * TOKEN_TILE and N % TOKEN_TILE == 0:
        return pl.pallas_call(
            kernel,
            grid=(N // TOKEN_TILE,),
            in_specs=[
                pl.BlockSpec((TOKEN_TILE, Din), lambda i: (i, 0)),
                pl.BlockSpec((TOKEN_TILE, 2), lambda i: (i, 0)),
                pl.BlockSpec(pack.shape, lambda i: (0, 0)),
            ],
            out_specs=pl.BlockSpec((TOKEN_TILE, 3 * LANE), lambda i: (i, 0)),
            out_shape=out_shape,
            compiler_params=pltpu.CompilerParams(dimension_semantics=("parallel",)),
        )(x, laac, pack)

    return pl.pallas_call(kernel, out_shape=out_shape)(x, laac, pack)


# -----------------------------------------------------------------------------
# Policy-equivalent forward (actor + critic) -- fully jitted host glue
# -----------------------------------------------------------------------------
def _policy_forward_impl(pack, inputs, laac_shallow, laac_deep, *, meta, act_dim):
    n_agents = len(inputs)
    batch = inputs[0].shape[0]
    x = jnp.stack(inputs).reshape(n_agents * batch, -1)
    # token order is agent-major (stack + flatten) -> laac.T.flatten matches it
    laac = jnp.stack([laac_shallow.T.reshape(-1), laac_deep.T.reshape(-1)],
                     axis=1).astype(jnp.int32)
    out = fused_policy_apply(x, laac, pack, meta)
    logits = out[:, :act_dim].reshape(n_agents, batch, act_dim)
    probs = out[:, LANE:LANE + act_dim].reshape(n_agents, batch, act_dim)
    values = out[:, 2 * LANE].reshape(n_agents, batch).T       # (batch, n_agents)
    return logits, probs, values


policy_forward = jax.jit(_policy_forward_impl, static_argnames=("meta", "act_dim"))


@functools.partial(jax.jit, static_argnames=("meta", "act_dim"))
def policy_act(pack, inputs, laac_shallow, laac_deep, sample_key, *, meta, act_dim):
    """Policy.act (no action mask): returns (actions, act_probs, values)."""
    logits, probs, values = _policy_forward_impl(
        pack, inputs, laac_shallow, laac_deep, meta=meta, act_dim=act_dim)
    n_agents = logits.shape[0]
    actions_all = jax.random.categorical(sample_key, logits, axis=-1)
    actions = [actions_all[i][:, None] for i in range(n_agents)]
    act_probs = [probs[i] for i in range(n_agents)]
    # TODO(synk): action_mask branch of Policy.act would add -1e5*(1-mask) to the
    # logits before the softmax; MultiCategorical.log_probs/entropy are host-side
    # distribution ops with no Pallas hot path.
    return actions, act_probs, values


# -----------------------------------------------------------------------------
# Parameter construction
# -----------------------------------------------------------------------------
def _init_expert_stack(key, n_experts, dims, scale=0.5):
    """Stack of `n_experts` MLPs with layer sizes `dims` (like _make_fc)."""
    Ws, Bs = [], []
    for d_in, d_out in zip(dims[:-1], dims[1:]):
        key, k1, k2 = jax.random.split(key, 3)
        Ws.append(scale * jax.random.normal(k1, (n_experts, d_in, d_out),
                                            dtype=jnp.float32) / jnp.sqrt(d_in))
        Bs.append(0.01 * jax.random.normal(k2, (n_experts, 1, d_out),
                                           dtype=jnp.float32))
    return key, Ws, Bs


# -----------------------------------------------------------------------------
# Pure-JAX reference (per-expert stacks, no packing) for verification
# -----------------------------------------------------------------------------
def _mlp_experts_ref(x, Ws, Bs, final_relu):
    outs = []
    for k in range(Ws[0].shape[0]):
        h = x
        for i, (W, B) in enumerate(zip(Ws, Bs)):
            h = jnp.dot(h, W[k], precision=jax.lax.Precision.HIGHEST) + B[k][0]
            if i < len(Ws) - 1 or final_relu:
                h = jnp.maximum(h, 0.0)
        outs.append(h)
    return jnp.stack(outs)


def _expert_gather(outs, idx):
    """outs: (K, n_agents, batch, D); idx: (batch, n_agents) ints in [0, K)."""
    idx_t = idx.T
    a = jnp.arange(outs.shape[1])[:, None]
    b = jnp.arange(outs.shape[2])[None, :]
    return outs[idx_t, a, b]


def actor_forward_ref(params, inputs, laac_shallow, laac_deep):
    n_agents = len(inputs)
    batch = inputs[0].shape[0]
    x = jnp.stack(inputs).reshape(n_agents * batch, -1)
    sh = _mlp_experts_ref(x, params["shallow_w"], params["shallow_b"], True)
    H = sh.shape[-1]
    sh = sh.reshape(sh.shape[0], n_agents, batch, H)
    shg = _expert_gather(sh, laac_shallow).reshape(n_agents * batch, H)
    dp = _mlp_experts_ref(shg, params["deep_w"], params["deep_b"], False)
    A = dp.shape[-1]
    dp = dp.reshape(dp.shape[0], n_agents, batch, A)
    return _expert_gather(dp, laac_deep)


def critic_forward_ref(params, inputs, laac_deep):
    n_agents = len(inputs)
    batch = inputs[0].shape[0]
    x = jnp.stack(inputs).reshape(n_agents * batch, -1)
    vs = _mlp_experts_ref(x, params["critic_w"], params["critic_b"], False)
    vs = vs.reshape(vs.shape[0], n_agents, batch, 1)
    return jnp.transpose(_expert_gather(vs, laac_deep)[..., 0])


# -----------------------------------------------------------------------------
if __name__ == "__main__":
    n_agents = 3
    batch = 8
    obs_dim = 16        # all agents share obs dim (torch.stack requires it)
    act_dim = 5
    hidden = [32, 32]   # architecture['actor'] == architecture['critic']
    laac_size = 2

    key = jax.random.PRNGKey(0)

    # Actor (MADPSNet): shallow nets [obs]+hidden (final ReLU), deep nets hidden+[act].
    key, sw, sb = _init_expert_stack(key, laac_size, [obs_dim] + hidden)
    key, dw, db = _init_expert_stack(key, laac_size, hidden + [act_dim])
    dw[-1] = dw[-1] * 0.01          # initial_as_the_same=True: small-gain last layer
    # Critic (MultiAgentFCNetwork): laac_size nets, dims [obs]+hidden+[1].
    key, cw, cb = _init_expert_stack(key, laac_size, [obs_dim] + hidden + [1])

    params_raw = {"shallow_w": sw, "shallow_b": sb,
                  "deep_w": dw, "deep_b": db,
                  "critic_w": cw, "critic_b": cb}
    pack, meta = build_fused_policy(params_raw, act_dim)

    # Per-agent observations
    key, k_in = jax.random.split(key)
    obs = jax.random.normal(k_in, (n_agents, batch, obs_dim), dtype=jnp.float32)
    inputs = [obs[i] for i in range(n_agents)]

    # Policy.sample_laac(batch): zeros column + Categorical(laac_params) samples
    key, k_laac, k_act = jax.random.split(key, 3)
    laac_logits = jnp.ones((n_agents - 1, laac_size), dtype=jnp.float32)
    sampled = jax.random.categorical(
        k_laac, jnp.broadcast_to(laac_logits, (batch, n_agents - 1, laac_size)))
    zeros_col = jnp.zeros((batch, 1), dtype=sampled.dtype)
    laac_shallow = jnp.concatenate([zeros_col, sampled], axis=1)   # (batch, n_agents)
    laac_deep = jnp.concatenate([zeros_col, sampled], axis=1)
    assert int(jnp.max(laac_deep)) < laac_size, "laac index out of range"

    # --- fused Pallas forward: actor logits + probs + critic values in one call ---
    logits, probs, values = policy_forward(pack, inputs, laac_shallow, laac_deep,
                                           meta=meta, act_dim=act_dim)
    actions, act_probs, _ = policy_act(pack, inputs, laac_shallow, laac_deep, k_act,
                                       meta=meta, act_dim=act_dim)
    jax.block_until_ready((logits, probs, values))
    jax.block_until_ready(actions)
    jax.block_until_ready(act_probs)

    # --- verify against the pure-JAX reference (unpacked per-expert params) -------
    logits_ref = actor_forward_ref(params_raw, inputs, laac_shallow, laac_deep)
    probs_ref = jax.nn.softmax(logits_ref, axis=-1)
    values_ref = critic_forward_ref(params_raw, inputs, laac_deep)

    assert jnp.allclose(logits, logits_ref, atol=1e-5, rtol=1e-4), "actor logits mismatch"
    assert jnp.allclose(probs, probs_ref, atol=1e-5, rtol=1e-4), "actor probs mismatch"
    assert jnp.allclose(values, values_ref, atol=1e-5, rtol=1e-4), "critic values mismatch"
    assert jnp.allclose(jnp.stack(act_probs), probs, atol=0.0), "act_probs mismatch"

    print("KERNEL_OK")
</pallas_src>

<mosaic_0001>
module attributes {stable_mosaic.version = 11 : i64} {
  func.func @kernel(%arg0: memref<24x16xf32, #tpu.memory_space<vmem>>, %arg1: memref<24x2xi32, #tpu.memory_space<vmem>>, %arg2: memref<312x256xf32, #tpu.memory_space<vmem>>, %arg3: memref<24x384xf32, #tpu.memory_space<vmem>>) attributes {dimension_semantics = [], scalar_prefetch = 0 : i64, scratch_operands = 0 : i64, tpu.core_type = #tpu.core_type<tc>} {
    %c0 = arith.constant 0 : index
    %c0_0 = arith.constant 0 : index
    %0 = vector.load %arg0[%c0, %c0_0] : memref<24x16xf32, #tpu.memory_space<vmem>>, vector<24x16xf32>
    %c0_1 = arith.constant 0 : index
    %c0_2 = arith.constant 0 : index
    %1 = vector.load %arg1[%c0_1, %c0_2] : memref<24x2xi32, #tpu.memory_space<vmem>>, vector<24x1xi32>
    %c0_3 = arith.constant 0 : index
    %c1 = arith.constant 1 : index
    %2 = vector.load %arg1[%c0_3, %c1] : memref<24x2xi32, #tpu.memory_space<vmem>>, vector<24x1xi32>
    %c0_4 = arith.constant 0 : index
    %c0_5 = arith.constant 0 : index
    %3 = vector.load %arg2[%c0_4, %c0_5] : memref<312x256xf32, #tpu.memory_space<vmem>>, vector<16x128xf32>
    %c304 = arith.constant 304 : index
    %c0_6 = arith.constant 0 : index
    %4 = vector.load %arg2[%c304, %c0_6] : memref<312x256xf32, #tpu.memory_space<vmem>>, vector<1x128xf32>
    %cst = arith.constant dense<0.000000e+00> : vector<24x128xf32>
    %5 = tpu.matmul %0, %3, %cst {dimension_numbers = #tpu.dot_dimension_numbers<[1], [0], [0], [1], [0, 0, 1, 1], [], []>} : vector<24x16xf32>, vector<16x128xf32>, vector<24x128xf32> -> vector<24x128xf32>
    %6 = vector.broadcast %4 : vector<1x128xf32> to vector<24x128xf32>
    %7 = arith.addf %5, %6 : vector<24x128xf32>
    %cst_7 = arith.constant 0.000000e+00 : f32
    %8 = vector.broadcast %cst_7 : f32 to vector<24x128xf32>
    %9 = arith.maximumf %7, %8 : vector<24x128xf32>
    %c16 = arith.constant 16 : index
    %c0_8 = arith.constant 0 : index
    %10 = vector.load %arg2[%c16, %c0_8] : memref<312x256xf32, #tpu.memory_space<vmem>>, vector<128x128xf32>
    %c305 = arith.constant 305 : index
    %c0_9 = arith.constant 0 : index
    %11 = vector.load %arg2[%c305, %c0_9] : memref<312x256xf32, #tpu.memory_space<vmem>>, vector<1x128xf32>
    %cst_10 = arith.constant dense<0.000000e+00> : vector<24x128xf32>
    %12 = tpu.matmul %9, %10, %cst_10 {dimension_numbers = #tpu.dot_dimension_numbers<[1], [0], [0], [1], [0, 0, 1, 1], [], []>} : vector<24x128xf32>, vector<128x128xf32>, vector<24x128xf32> -> vector<24x128xf32>
    %13 = vector.broadcast %11 : vector<1x128xf32> to vector<24x128xf32>
    %14 = arith.addf %12, %13 : vector<24x128xf32>
    %cst_11 = arith.constant 0.000000e+00 : f32
    %15 = vector.broadcast %cst_11 : f32 to vector<24x128xf32>
    %16 = arith.maximumf %14, %15 : vector<24x128xf32>
    %17 = vector.extract_strided_slice %16 {offsets = [0, 64], sizes = [24, 64], strides = [1, 1]} : vector<24x128xf32> to vector<24x64xf32>
    %c0_i32 = arith.constant 0 : i32
    %18 = vector.broadcast %c0_i32 : i32 to vector<24x1xi32>
    %19 = arith.cmpi eq, %1, %18 : vector<24x1xi32>
    %20 = arith.extui %19 : vector<24x1xi1> to vector<24x1xi32>
    %21 = arith.sitofp %20 : vector<24x1xi32> to vector<24x1xf32>
    %22 = vector.extract_strided_slice %16 {offsets = [0, 0], sizes = [24, 32], strides = [1, 1]} : vector<24x128xf32> to vector<24x32xf32>
    %23 = vector.broadcast %21 : vector<24x1xf32> to vector<24x32xf32>
    %24 = arith.mulf %22, %23 : vector<24x32xf32>
    %c1_i32 = arith.constant 1 : i32
    %25 = vector.broadcast %c1_i32 : i32 to vector<24x1xi32>
    %26 = arith.cmpi eq, %1, %25 : vector<24x1xi32>
    %27 = arith.extui %26 : vector<24x1xi1> to vector<24x1xi32>
    %28 = arith.sitofp %27 : vector<24x1xi32> to vector<24x1xf32>
    %29 = vector.extract_strided_slice %16 {offsets = [0, 32], sizes = [24, 32], strides = [1, 1]} : vector<24x128xf32> to vector<24x32xf32>
    %30 = vector.broadcast %28 : vector<24x1xf32> to vector<24x32xf32>
    %31 = arith.mulf %29, %30 : vector<24x32xf32>
    %32 = arith.addf %24, %31 : vector<24x32xf32>
    %c144 = arith.constant 144 : index
    %c0_12 = arith.constant 0 : index
    %33 = vector.load %arg2[%c144, %c0_12] : memref<312x256xf32, #tpu.memory_space<vmem>>, vector<32x64xf32>
    %c306 = arith.constant 306 : index
    %c0_13 = arith.constant 0 : index
    %34 = vector.load %arg2[%c306, %c0_13] : memref<312x256xf32, #tpu.memory_space<vmem>>, vector<1x64xf32>
    %cst_14 = arith.constant dense<0.000000e+00> : vector<24x64xf32>
    %35 = tpu.matmul %32, %33, %cst_14 {dimension_numbers = #tpu.dot_dimension_numbers<[1], [0], [0], [1], [0, 0, 1, 1], [], []>} : vector<24x32xf32>, vector<32x64xf32>, vector<24x64xf32> -> vector<24x64xf32>
    %36 = vector.broadcast %34 : vector<1x64xf32> to vector<24x64xf32>
    %37 = arith.addf %35, %36 : vector<24x64xf32>
    %cst_15 = arith.constant 0.000000e+00 : f32
    %38 = vector.broadcast %cst_15 : f32 to vector<24x64xf32>
    %39 = arith.maximumf %37, %38 : vector<24x64xf32>
    %40 = tpu.concatenate %39, %17 in 1 : vector<24x64xf32>, vector<24x64xf32> -> vector<24x128xf32>
    %c176 = arith.constant 176 : index
    %c0_16 = arith.constant 0 : index
    %41 = vector.load %arg2[%c176, %c0_16] : memref<312x256xf32, #tpu.memory_space<vmem>>, vector<128x256xf32>
    %c307 = arith.constant 307 : index
    %c0_17 = arith.constant 0 : index
    %42 = vector.load %arg2[%c307, %c0_17] : memref<312x256xf32, #tpu.memory_space<vmem>>, vector<1x256xf32>
    %cst_18 = arith.constant dense<0.000000e+00> : vector<24x256xf32>
    %43 = tpu.matmul %40, %41, %cst_18 {dimension_numbers = #tpu.dot_dimension_numbers<[1], [0], [0], [1], [0, 0, 1, 1], [], []>} : vector<24x128xf32>, vector<128x256xf32>, vector<24x256xf32> -> vector<24x256xf32>
    %44 = vector.broadcast %42 : vector<1x256xf32> to vector<24x256xf32>
    %45 = arith.addf %43, %44 : vector<24x256xf32>
    %c0_i32_19 = arith.constant 0 : i32
    %46 = vector.broadcast %c0_i32_19 : i32 to vector<24x1xi32>
    %47 = arith.cmpi eq, %2, %46 : vector<24x1xi32>
    %48 = arith.extui %47 : vector<24x1xi1> to vector<24x1xi32>
    %49 = arith.sitofp %48 : vector<24x1xi32> to vector<24x1xf32>
    %c1_i32_20 = arith.constant 1 : i32
    %50 = vector.broadcast %c1_i32_20 : i32 to vector<24x1xi32>
    %51 = arith.cmpi eq, %2, %50 : vector<24x1xi32>
    %52 = arith.extui %51 : vector<24x1xi1> to vector<24x1xi32>
    %53 = arith.sitofp %52 : vector<24x1xi32> to vector<24x1xf32>
    %54 = vector.extract_strided_slice %45 {offsets = [0, 0], sizes = [24, 64], strides = [1, 1]} : vector<24x256xf32> to vector<24x64xf32>
    %55 = vector.broadcast %49 : vector<24x1xf32> to vector<24x64xf32>
    %56 = arith.mulf %54, %55 : vector<24x64xf32>
    %57 = vector.extract_strided_slice %45 {offsets = [0, 64], sizes = [24, 64], strides = [1, 1]} : vector<24x256xf32> to vector<24x64xf32>
    %58 = vector.broadcast %53 : vector<24x1xf32> to vector<24x64xf32>
    %59 = arith.mulf %57, %58 : vector<24x64xf32>
    %60 = arith.addf %56, %59 : vector<24x64xf32>
    %61 = vector.extract_strided_slice %45 {offsets = [0, 128], sizes = [24, 64], strides = [1, 1]} : vector<24x256xf32> to vector<24x64xf32>
    %62 = vector.broadcast %49 : vector<24x1xf32> to vector<24x64xf32>
    %63 = arith.mulf %61, %62 : vector<24x64xf32>
    %64 = vector.extract_strided_slice %45 {offsets = [0, 192], sizes = [24, 64], strides = [1, 1]} : vector<24x256xf32> to vector<24x64xf32>
    %65 = vector.broadcast %53 : vector<24x1xf32> to vector<24x64xf32>
    %66 = arith.mulf %64, %65 : vector<24x64xf32>
    %67 = arith.addf %63, %66 : vector<24x64xf32>
    %cst_21 = arith.constant -1.000000e+09 : f32
    %68 = vector.broadcast %cst_21 : f32 to vector<24x64xf32>
    %69 = tpu.concatenate %60, %68 in 1 : vector<24x64xf32>, vector<24x64xf32> -> vector<24x128xf32>
    %cst_22 = arith.constant 0.000000e+00 : f32
    %70 = vector.broadcast %cst_22 : f32 to vector<24x64xf32>
    %71 = tpu.concatenate %67, %70 in 1 : vector<24x64xf32>, vector<24x64xf32> -> vector<24x128xf32>
    %cst_23 = arith.constant dense<0xFF800000> : vector<24xf32>
    %72 = vector.multi_reduction <maximumf>, %69, %cst_23 [1] : vector<24x128xf32> to vector<24xf32>
    %73 = vector.shape_cast %72 : vector<24xf32> to vector<24x1xf32>
    %74 = vector.broadcast %73 : vector<24x1xf32> to vector<24x128xf32>
    %75 = arith.subf %69, %74 : vector<24x128xf32>
    %76 = math.exp %75 : vector<24x128xf32>
    %cst_24 = arith.constant dense<0.000000e+00> : vector<24xf32>
    %77 = vector.multi_reduction <add>, %76, %cst_24 [1] : vector<24x128xf32> to vector<24xf32>
    %78 = vector.shape_cast %77 : vector<24xf32> to vector<24x1xf32>
    %79 = tpu.reciprocal %78 : vector<24x1xf32> -> vector<24x1xf32>
    %80 = vector.broadcast %79 : vector<24x1xf32> to vector<24x128xf32>
    %81 = arith.mulf %76, %80 : vector<24x128xf32>
    %c0_25 = arith.constant 0 : index
    %c0_26 = arith.constant 0 : index
    %82 = vector.load %arg3[%c0_25, %c0_26] : memref<24x384xf32, #tpu.memory_space<vmem>>, vector<24x128xf32>
    tpu.vector_store %arg3[%c0_25, %c0_26], %69 {strides = array<i32>} : memref<24x384xf32, #tpu.memory_space<vmem>>, vector<24x128xf32>,
    %c0_27 = arith.constant 0 : index
    %c128 = arith.constant 128 : index
    %83 = vector.load %arg3[%c0_27, %c128] : memref<24x384xf32, #tpu.memory_space<vmem>>, vector<24x128xf32>
    tpu.vector_store %arg3[%c0_27, %c128], %81 {strides = array<i32>} : memref<24x384xf32, #tpu.memory_space<vmem>>, vector<24x128xf32>,
    %c0_28 = arith.constant 0 : index
    %c256 = arith.constant 256 : index
    %84 = vector.load %arg3[%c0_28, %c256] : memref<24x384xf32, #tpu.memory_space<vmem>>, vector<24x128xf32>
    tpu.vector_store %arg3[%c0_28, %c256], %71 {strides = array<i32>} : memref<24x384xf32, #tpu.memory_space<vmem>>, vector<24x128xf32>,
    return
  }
}

</mosaic_0001>

<bundles_post_ra>
// kernel: squeeze.1
= control target key start
LH: loop header
LB: loop body
LE: loop exit
PB: predicated region body
PF: predicated region fallthrough
CT: control target
= control target key end

     0   :  { %s93_s0 = inlined_call_operand.vmem [shape: f32[24], index: 0, kind: input, shape index: {}]   ;;  %s94_s1 = inlined_call_operand.hbm [shape: f32[3,8], index: 1, kind: output, shape index: {}]  }
   0x1   :  { %v5_v0 = vld [vmem:[%s93_s0] sm:$0x1] }
   0x2   :  { %6 = vst [vmem:[#allocation3] sm:$0x1] %v5_v0 }
   0x3   :  { %2 = vsyncpa [#allocation1], 0  ;;  %vm8_vm0 = vcmask 64512   ;;  %s65_s0 = smov 120   ;;  %s66_s8 = smov 112  }
   0x4   :  { %s67_s9 = smov [#allocation0]  }
   0x5   :  { %s32_s10 = sshll.u32 %s67_s9, 4  ;;  %s33_s10 = int_to_ptr.vmem [resolvable:$true] %s32_s10 }
   0x6   :  { %s41_s11 = scalar_lea.vmem %s33_s10, 64  ;;  %p46_p1 = scmp.lt.s32.totalorder %s33_s10, %s33_s10 }
   0x7   :  { %p42_p0 = scmp.ne.s32.totalorder %s33_s10, %s41_s11  ;;  %p47_p2 = scmp.lt.s32.totalorder %s41_s11, %s41_s11 }
   0x9   :  { %v10_v1 = vld [vmem:[#allocation3] sm:$0x1]   ;;  %p48_p3 = por %p47_p2, %p46_p1 }
   0xa   :  { %v7_v2 = vld [vmem:[#allocation3] sm:$0x1]   ;;  %11 = vrot.lane.b32.xlu0 %v10_v1, %s65_s0 }
   0xb   :  { %9 = vst.msk [vmem:[#allocation2] sm:$0x1] %vm8_vm0, %v7_v2   ;;  %v16_v3 = vld [vmem:[#allocation3] sm:$0x1]   ;;  %p49_p4 = pnand %p48_p3, %p42_p0 }
   0xe   :  { %17 = vrot.lane.b32.xlu0 %v16_v3, %s66_s8 }
  0x7c   :  { %v12_v4 = vpop.permute.xlu0 %11  }
  0x7d   :  { %15 = vst.msk [vmem:[#allocation2 + $0x1] sm:$0x1] %vm8_vm0, %v12_v4  }
  0x80   :  { %v18_v5 = vpop.permute.xlu0 %17  }
  0x81   :  { %21 = vst.msk [vmem:[#allocation2 + $0x2] sm:$0x1] %vm8_vm0, %v18_v5  }
  0x88   :  { %v25_v6 = vld [vmem:[#allocation2] sm:$0xf] }
  0x89   :  { %27 = vst [vmem:[#allocation0] sm:$0xf] %v25_v6 }
  0x8a   :  { %52 = shalt.err (!%p49_p4)
}
  0x8b   :  { %s53_s14 = scalar_lea.hbm %s94_s1, 64 }
  0x8c   :  { %p54_p5 = scmp.ne.s32.totalorder %s94_s1, %s53_s14  ;;  %p57_p6 = scmp.lt.u32.totalorder %s53_s14, %s94_s1 }
  0x8e   :  { %p59_p7 = pnand %p57_p6, %p54_p5 }
  0x90   :  { %62 = shalt.err (!%p59_p7)
}
  0x91   :  { %35 = dma.vmem_to_hbm [thread:$0]  %s33_s10, 64, %s94_s1, [#allocation1]  }
  0x92   :  { %63 = dma.done.wait [#allocation1], 64  }
  0x93   :  { %64 = vsyncadd [#allocation1], 4294967232 }
  0x94   :  { %37 = vsyncpa [#allocation1], 1 }

// kernel: _policy_forward_impl.1
= control target key start
LH: loop header
LB: loop body
LE: loop exit
PB: predicated region body
PF: predicated region fallthrough
CT: control target
= control target key end

     0   :  { %8 = vsyncpa [#allocation3], 0  ;;  %s881_s12 = smov [#allocation2]   ;;  %s1080_s0 = inlined_call_operand.vmem [shape: f32[24,16], index: 0, kind: input, shape index: {}]   ;;  %s1081_s1 = inlined_call_operand.vmem [shape: s32[24,2], index: 1, kind: input, shape index: {}]   ;;  %s1082_s2 = inlined_call_operand.hbm [shape: f32[312,256], index: 2, kind: input, shape index: {}]   ;;  %s1083_s3 = inlined_call_operand.vmem [shape: f32[24,384], index: 3, kind: output, shape index: {}]  }
   0x1   :  { %s18_s13 = sshll.u32 %s881_s12, 4  ;;  %s857_s16 = scalar_lea.hbm %s1082_s2, 9984  ;;  %s19_s13 = int_to_ptr.vmem [resolvable:$true] %s18_s13 }
   0x2   :  { %p858_p0 = scmp.ne.s32.totalorder %s1082_s2, %s857_s16  ;;  %p861_p1 = scmp.lt.u32.totalorder %s857_s16, %s1082_s2 }
   0x4   :  { %p863_p2 = pnand %p861_p1, %p858_p0 }
   0x6   :  { %866 = shalt.err (!%p863_p2)
}
   0x7   :  { %s867_s21 = scalar_lea.vmem %s19_s13, 9984  ;;  %p872_p4 = scmp.lt.s32.totalorder %s19_s13, %s19_s13 }
   0x8   :  { %p868_p3 = scmp.ne.s32.totalorder %s19_s13, %s867_s21  ;;  %p873_p5 = scmp.lt.s32.totalorder %s867_s21, %s867_s21 }
   0xa   :  { %p874_p6 = por %p873_p5, %p872_p4 }
   0xc   :  { %p875_p7 = pnand %p874_p6, %p868_p3 }
   0xe   :  { %878 = shalt.err (!%p875_p7)
}
   0xf   :  { %s882_s22 = smov 256   ;;  %s883_s23 = smov 16  }
  0x10   :  { %24 = dma.hbm_to_vmem [thread:$0]  %s1082_s2, 9984, %s19_s13, [#allocation3], %s882_s22, %s882_s22, %s883_s23  }
  0x11   :  { %879 = dma.done.wait [#allocation3], 9984  }
  0x12   :  { %880 = vsyncadd [#allocation3], 4294957312  ;;  %v884_v0 = vmov 0.0|0.0   ;;  %vm885_vm0 = vmmov 0   ;;  %v886_v1 = vmov 0.0   ;;  %v34_v2 = vld [vmem:[#allocation2] sm:$0xff] }
  0x13   :  { %756 = vmatprep.subr.bf16.mxu1 %v884_v0  ;;  %689 = vmatprep.mubr.msk.f32.mxu1 %vm885_vm0, %v886_v1  ;;  %v35_v3 = vld [vmem:[#allocation2 + $0x10] sm:$0xff]  ;;  %v130_v5 = vld [vmem:[#allocation2 + $0x20] sm:$0xff]  ;;  %vm37_vm1 = vcmask 130048   ;;  %v29_v11 = vld [vmem:[%s1080_s0 + $0x8] sm:$0xff]  ;;  %v887_v35 = vmov 0   ;;  %vm304_vm8 = vcmask 261120  }
  0x14   :  { %783 = vmatprep.subr.bf16.mxu0 %v884_v0  ;;  %747 = vmatprep.mubr.msk.f32.mxu0 %vm885_vm0, %v886_v1  ;;  %v757_v4 = vpack.c.bf16 %v35_v3, %v34_v2  ;;  %v131_v6 = vld [vmem:[#allocation2 + $0x30] sm:$0xff]  ;;  %v28_v7 = vld [vmem:[%s1080_s0] sm:$0xff]  ;;  %v32_v33 = vld [vmem:[%s1081_s1 + $0x8] sm:$0xff]  ;;  %vm397_vm9 = vcmask 523264   ;;  %s890_s9 = smov 64  }
  0x15   :  { %v760_v8 = vpack.c.bf16 %v131_v6, %v130_v5  ;;  %v132_v9 = vld [vmem:[#allocation2 + $0x40] sm:$0xff]  ;;  %v133_v10 = vld [vmem:[#allocation2 + $0x50] sm:$0xff]  ;;  %831 = vset.pattern.permute.xlu0 %v887_v35  ;;  %vm258_vm3 = vcmp.eq.s32.totalorder %v32_v33, 1  ;;  %832 = vset.pattern.permute.xlu1 %v887_v35  ;;  %vm231_vm5 = vcmp.eq.s32.totalorder %v32_v33, 0 }
  0x16   :  { %758 = vmatpush3.bf16.msra.mxu1 %v757_v4  ;;  %v763_v12 = vpack.c.bf16 %v133_v10, %v132_v9  ;;  %v134_v13 = vld [vmem:[#allocation2 + $0x60] sm:$0xff]  ;;  %v135_v14 = vld [vmem:[#allocation2 + $0x70] sm:$0xff]  ;;  %v968_v37 = vsel %vm258_vm3, 1.0, %v886_v1  ;;  %v978_v40 = vsel %vm231_vm5, 1.0, %v886_v1  ;;  %v404_v9 = vld [vmem:[#allocation2 + $0x178] sm:$0xff] }
  0x17   :  { %759 = vmatprep.subr.bf16.mxu1 %v884_v0  ;;  %v30_v15 = vld [vmem:[%s1080_s0 + $0x10] sm:$0xff]  ;;  %v766_v16 = vpack.c.bf16 %v135_v14, %v134_v13  ;;  %v136_v17 = vld [vmem:[#allocation2 + $0x80] sm:$0xff] }
  0x18   :  { %v137_v18 = vld [vmem:[#allocation2 + $0x90] sm:$0xff]  ;;  %v138_v20 = vld [vmem:[#allocation2 + $0xa0] sm:$0xff] }
  0x19   :  { %690 = vmatmul.mubr.msk.f32.vlgmr.msra.gmra.mrb[0].mxu1 %vm37_vm1, %v28_v7  ;;  %v769_v19 = vpack.c.bf16 %v137_v18, %v136_v17  ;;  %v139_v21 = vld [vmem:[#allocation2 + $0xb0] sm:$0xff]  ;;  %v140_v23 = vld [vmem:[#allocation2 + $0xc0] sm:$0xff] }
  0x1a   :  { %692 = vmatprep.mubr.msk.f32.mxu1 %vm885_vm0, %v886_v1  ;;  %761 = vmatpush3.bf16.msra.mxu1 %v760_v8  ;;  %v772_v22 = vpack.c.bf16 %v139_v21, %v138_v20  ;;  %v141_v24 = vld [vmem:[#allocation2 + $0xd0] sm:$0xff]  ;;  %v142_v26 = vld [vmem:[#allocation2 + $0xe0] sm:$0xff]  ;;  %v402_v8 = vld [vmem:[#allocation2 + $0x168] sm:$0xff] }
  0x1b   :  { %762 = vmatprep.subr.bf16.mxu1 %v884_v0  ;;  %v775_v25 = vpack.c.bf16 %v141_v24, %v140_v23  ;;  %v143_v27 = vld [vmem:[#allocation2 + $0xf0] sm:$0xff]  ;;  %v144_v29 = vld [vmem:[#allocation2 + $0x100] sm:$0xff]  ;;  %v789_v13 = vpack.c.bf16 %v404_v9, %v402_v8  ;;  %v424_v8 = vld [vmem:[#allocation2 + $0x218] sm:$0xff] }
  0x1c   :  { %v778_v28 = vpack.c.bf16 %v143_v27, %v142_v26  ;;  %v145_v30 = vld [vmem:[#allocation2 + $0x110] sm:$0xff]  ;;  %v31_v32 = vld [vmem:[%s1081_s1] sm:$0xff]  ;;  %v406_v26 = vld [vmem:[#allocation2 + $0x188] sm:$0xff] }
  0x1d   :  { %693 = vmatmul.mubr.msk.f32.gmra.mrb[2].mxu1 %vm37_vm1, %v29_v11  ;;  %v781_v31 = vpack.c.bf16 %v145_v30, %v144_v29  ;;  %v33_v34 = vld [vmem:[%s1081_s1 + $0x10] sm:$0xff]  ;;  %vm257_vm2 = vcmp.eq.s32.totalorder %v31_v32, 1  ;;  %vm230_vm6 = vcmp.eq.s32.totalorder %v31_v32, 0  ;;  %v36_v44 = vld [vmem:[#allocation2 + $0x260] ss:$0 sm:$0xff]  ;;  %s888_s1 = smov 96  }
  0x1e   :  { %695 = vmatprep.mubr.msk.f32.mxu1 %vm885_vm0, %v886_v1  ;;  %764 = vmatpush3.bf16.msra.mxu1 %v763_v12  ;;  %vm259_vm4 = vcmp.eq.s32.totalorder %v33_v34, 1  ;;  %v965_v36 = vsel %vm257_vm2, 1.0, %v886_v1  ;;  %v981_v41 = vsel %vm230_vm6, 1.0, %v886_v1  ;;  %vm232_vm7 = vcmp.eq.s32.totalorder %v33_v34, 0  ;;  %v299_v57 = vld [vmem:[#allocation2 + $0x120] sm:$0xff]  ;;  %v300_v58 = vld [vmem:[#allocation2 + $0x130] sm:$0xff] }
  0x1f   :  { %765 = vmatprep.subr.bf16.mxu1 %v884_v0  ;;  %v971_v38 = vsel %vm259_vm4, 1.0, %v886_v1  ;;  %v834_v39 = vpack.i.bf16 %v968_v37, %v965_v36  ;;  %268 = vperm.xlu0 %831, %v965_v36   ;;  %v840_v42 = vpack.i.bf16 %v978_v40, %v981_v41  ;;  %v988_v43 = vsel %vm232_vm7, 1.0, %v886_v1  ;;  %v301_v59 = vld [vmem:[#allocation2 + $0x140] sm:$0xff]  ;;  %v302_v61 = vld [vmem:[#allocation2 + $0x150] sm:$0xff]  ;;  %v408_v27 = vld [vmem:[#allocation2 + $0x198] sm:$0xff] }
  0x20   :  { %278 = vperm.xlu1 %832, %v971_v38   ;;  %v784_v60 = vpack.c.bf16 %v300_v58, %v299_v57  ;;  %v787_v62 = vpack.c.bf16 %v302_v61, %v301_v59  ;;  %v146_v63 = vld [vmem:[#allocation2 + $0x261] ss:$0 sm:$0xff]  ;;  %v793_v33 = vpack.c.bf16 %v408_v27, %v406_v26  ;;  %v407_v35 = vld [vmem:[#allocation2 + $0x190] sm:$0xff]  ;;  %v889_v27 = vmov 1  }
  0x21   :  { %696 = vmatmul.mubr.msk.f32.gmra.mrb[4].mxu1 %vm37_vm1, %v30_v15  ;;  %v401_v24 = vld [vmem:[#allocation2 + $0x160] sm:$0xff]  ;;  %v415_v61 = vld [vmem:[#allocation2 + $0x1d0] sm:$0xff] }
  0x22   :  { %767 = vmatpush3.bf16.msra.mxu1 %v766_v16  ;;  %730 = vmatprep.mubr.msk.f32.mxu1 %vm885_vm0, %v886_v1  ;;  %v405_v34 = vld [vmem:[#allocation2 + $0x180] sm:$0xff] }
  0x23   :  { %768 = vmatprep.subr.bf16.mxu1 %v884_v0  ;;  %273 = vperm.xlu0 %831, %v968_v37  }
  0x24   :  { %241 = vperm.xlu1 %832, %v981_v41   ;;  %785 = vmatpush3.bf16.msra.mxu0 %v784_v60  ;;  %v413_v60 = vld [vmem:[#allocation2 + $0x1c0] sm:$0xff] }
  0x25   :  { %786 = vmatprep.subr.bf16.mxu0 %v884_v0 }
  0x26   :  { %770 = vmatpush3.bf16.msra.mxu1 %v769_v19 }
  0x27   :  { %771 = vmatprep.subr.bf16.mxu1 %v884_v0  ;;  %246 = vperm.xlu0 %831, %v978_v40  }
  0x28   :  { %251 = vperm.xlu1 %832, %v988_v43   ;;  %788 = vmatpush3.bf16.msra.mxu0 %v787_v62  ;;  %v418_v62 = vld [vmem:[#allocation2 + $0x1e8] sm:$0xff] }
  0x29   :  { %790 = vmatprep.subr.bf16.mxu0 %v789_v13  ;;  %v426_v13 = vld [vmem:[#allocation2 + $0x228] sm:$0xff] }
  0x2a   :  { %773 = vmatpush3.bf16.msra.mxu1 %v772_v22 }
  0x2b   :  { %774 = vmatprep.subr.bf16.mxu1 %v884_v0  ;;  %839 = vset.pattern.permute.xlu0 %v889_v27 }
  0x2c   :  { %833 = vset.pattern.permute.xlu1 %v889_v27 }
  0x2e   :  { %776 = vmatpush3.bf16.msra.mxu1 %v775_v25  ;;  %v403_v25 = vld [vmem:[#allocation2 + $0x170] sm:$0xff] }
  0x2f   :  { %777 = vmatprep.subr.bf16.mxu1 %v884_v0 }
  0x32   :  { %779 = vmatpush3.bf16.msra.mxu1 %v778_v28 }
  0x33   :  { %780 = vmatprep.subr.bf16.mxu1 %v884_v0 }
  0x36   :  { %782 = vmatpush3.bf16.msra.mxu1 %v781_v31  ;;  %v791_v31 = vpack.c.bf16 %v403_v25, %v401_v24  ;;  %v429_v24 = vld [vmem:[#allocation2 + $0x240] sm:$0xff]  ;;  %v431_v25 = vld [vmem:[#allocation2 + $0x250] sm:$0xff] }
  0x37   :  { %v819_v26 = vpack.c.bf16 %v431_v25, %v429_v24 }
  0x9e   :  { %v269_v5 = vpop.permute.xlu0 %268 }
  0x9f   :  { %v279_v20 = vpop.permute.xlu1 %278 }
  0xa2   :  { %v274_v0 = vpop.permute.xlu0 %273 }
  0xa3   :  { %v242_v23 = vpop.permute.xlu1 %241 }
  0xa6   :  { %v247_v22 = vpop.permute.xlu0 %246 }
  0xa7   :  { %v252_v29 = vpop.permute.xlu1 %251 }
  0xec   :  { %v113_v45 = vpop.f32.mrb[0].mxu1 }
  0xed   :  { %v114_v46 = vadd.f32 %v113_v45, %v36_v44  ;;  %v691_v47 = vpop.f32.mrb[1].mxu1  ;;  %v412_v45 = vld [vmem:[#allocation2 + $0x1b8] sm:$0xff] }
  0xef   :  { %v127_v48 = vmax.f32 %v114_v46, 0.0 }
  0xf0   :  { %v118_v49 = vpop.f32.mrb[2].mxu1 }
  0xf1   :  { %v119_v50 = vadd.f32 %v118_v49, %v36_v44  ;;  %731 = vmatmul.mubr.f32.vlgmr.msra.gmra.mrb[6].mxu1 %v127_v48  ;;  %v694_v51 = vpop.f32.mrb[3].mxu1  ;;  %v795_v48 = vpack.c.bf16 %v407_v35, %v405_v34 }
  0xf2   :  { %733 = vmatprep.mubr.msk.f32.mxu1 %vm885_vm0, %v886_v1  ;;  %v409_v51 = vld [vmem:[#allocation2 + $0x1a0] sm:$0xff] }
  0xf3   :  { %v128_v52 = vmax.f32 %v119_v50, 0.0 }
  0xf4   :  { %v123_v53 = vpop.f32.mrb[4].mxu1 }
  0xf5   :  { %v124_v54 = vadd.f32 %v123_v53, %v36_v44  ;;  %734 = vmatmul.mubr.f32.gmra.mrb[8].mxu1 %v128_v52  ;;  %v697_v55 = vpop.f32.mrb[5].mxu1  ;;  %v410_v44 = vld [vmem:[#allocation2 + $0x1a8] sm:$0xff]  ;;  %v411_v52 = vld [vmem:[#allocation2 + $0x1b0] sm:$0xff] }
  0xf6   :  { %736 = vmatprep.mubr.msk.f32.mxu1 %vm885_vm0, %v886_v1  ;;  %v797_v50 = vpack.c.bf16 %v412_v45, %v410_v44  ;;  %v414_v53 = vld [vmem:[#allocation2 + $0x1c8] sm:$0xff]  ;;  %v799_v57 = vpack.c.bf16 %v411_v52, %v409_v51 }
  0xf7   :  { %v129_v56 = vmax.f32 %v124_v54, 0.0  ;;  %v416_v54 = vld [vmem:[#allocation2 + $0x1d8] sm:$0xff] }
  0xf8   :  { %v801_v59 = vpack.c.bf16 %v416_v54, %v414_v53 }
  0xf9   :  { %737 = vmatmul.mubr.f32.gmra.mrb[10].mxu1 %v129_v56 }
 0x1c4   :  { %v213_v2 = vpop.f32.mrb[6].mxu1 }
 0x1c5   :  { %v214_v3 = vadd.f32 %v213_v2, %v146_v63  ;;  %v732_v4 = vpop.f32.mrb[7].mxu1  ;;  %v803_v2 = vpack.c.bf16 %v415_v61, %v413_v60 }
 0x1c6   :  { %v417_v4 = vld [vmem:[#allocation2 + $0x1e0] sm:$0xff] }
 0x1c7   :  { %v997_v6 = vmax.f32 %v214_v3, 0.0 }
 0x1c8   :  { %v218_v7 = vpop.f32.mrb[8].mxu1 }
 0x1c9   :  { %v219_v10 = vadd.f32 %v218_v7, %v146_v63  ;;  %v281_v11 = vmul.f32 %v269_v5, %v997_v6  ;;  %v735_v12 = vpop.f32.mrb[9].mxu1  ;;  %v254_v28 = vmul.f32 %v242_v23, %v997_v6  ;;  %v419_v5 = vld [vmem:[#allocation2 + $0x1f0] sm:$0xff]  ;;  %v422_v7 = vld [vmem:[#allocation2 + $0x208] sm:$0xff] }
 0x1ca   :  { %v807_v9 = vpack.c.bf16 %v419_v5, %v417_v4  ;;  %v423_v12 = vld [vmem:[#allocation2 + $0x210] sm:$0xff] }
 0x1cb   :  { %v1000_v14 = vmax.f32 %v219_v10, 0.0  ;;  %287 = vrot.lane.b32.xlu0 %v281_v11, %s888_s1  ;;  %v809_v10 = vpack.c.bf16 %v424_v8, %v422_v7  ;;  %v421_v11 = vld [vmem:[#allocation2 + $0x200] sm:$0xff] }
 0x1cc   :  { %v223_v15 = vpop.f32.mrb[10].mxu1 }
 0x1cd   :  { %v224_v16 = vadd.f32 %v223_v15, %v146_v63  ;;  %v282_v17 = vmul.f32 %v274_v0, %v1000_v14  ;;  %v738_v18 = vpop.f32.mrb[11].mxu1  ;;  %v255_v46 = vmul.f32 %v247_v22, %v1000_v14  ;;  %v420_v63 = vld [vmem:[#allocation2 + $0x1f8] sm:$0xff]  ;;  %v811_v15 = vpack.c.bf16 %v423_v12, %v421_v11 }
 0x1ce   :  { %v805_v3 = vpack.c.bf16 %v420_v63, %v418_v62  ;;  %v428_v0 = vld [vmem:[#allocation2 + $0x238] sm:$0xff]  ;;  %v427_v18 = vld [vmem:[#allocation2 + $0x230] sm:$0xff] }
 0x1cf   :  { %v1003_v19 = vmax.f32 %v224_v16, 0.0  ;;  %289 = vrot.lane.b32.xlu1 %v282_v17, %s888_s1  ;;  %v813_v16 = vpack.c.bf16 %v428_v0, %v426_v13  ;;  %v425_v17 = vld [vmem:[#allocation2 + $0x220] sm:$0xff]  ;;  %v432_v22 = vld [vmem:[#allocation2 + $0x258] sm:$0xff] }
 0x1d1   :  { %v283_v21 = vmul.f32 %v279_v20, %v1003_v19  ;;  %v256_v55 = vmul.f32 %v252_v29, %v1003_v19  ;;  %v815_v20 = vpack.c.bf16 %v427_v18, %v425_v17 }
 0x1d3   :  { %291 = vrot.lane.b32.xlu0 %v283_v21, %s888_s1  ;;  %v430_v21 = vld [vmem:[#allocation2 + $0x248] sm:$0xff]  ;;  %835 = vperm.xlu1 %833, %v834_v39  }
 0x1d4   :  { %v817_v23 = vpack.c.bf16 %v432_v22, %v430_v21 }
 0x1d7   :  { %553 = vperm.xlu0 %839, %v971_v38   ;;  %841 = vperm.xlu1 %833, %v840_v42  }
 0x1db   :  { %538 = vperm.xlu1 %833, %v988_v43  }
 0x23d   :  { %v288_v30 = vpop.permute.xlu0 %287 }
 0x23e   :  { %v296_v32 = vadd.f32 %v288_v30, %v254_v28  ;;  %v303_v28 = vld [vmem:[#allocation2 + $0x262] ss:$0 sm:$0xff] }
 0x240   :  { %748 = vmatmul.mubr.msk.f32.vlgmr.msra.gmra.mrb[0].mxu0 %vm304_vm8, %v296_v32 }
 0x241   :  { %v290_v47 = vpop.permute.xlu1 %289  ;;  %750 = vmatprep.mubr.msk.f32.mxu0 %vm885_vm0, %v886_v1  ;;  %792 = vmatpush1.bf16.msra.mxu0 %v791_v31 }
 0x242   :  { %v297_v49 = vadd.f32 %v290_v47, %v255_v46  ;;  %794 = vmatprep.subr.bf16.mxu0 %v793_v33  ;;  %v434_v47 = vld [vmem:[#allocation2 + $0x263] ss:$8 sm:$0x3] }
 0x244   :  { %751 = vmatmul.mubr.msk.f32.gmra.mrb[2].mxu0 %vm304_vm8, %v297_v49 }
 0x245   :  { %v292_v56 = vpop.permute.xlu0 %291  ;;  %753 = vmatprep.mubr.msk.f32.mxu0 %vm885_vm0, %v886_v1  ;;  %796 = vmatpush1.bf16.msra.mxu0 %v795_v48 }
 0x246   :  { %v298_v58 = vadd.f32 %v292_v56, %v256_v55  ;;  %798 = vmatprep.subr.bf16.mxu0 %v797_v50 }
 0x248   :  { %754 = vmatmul.mubr.msk.f32.gmra.mrb[4].mxu0 %vm304_vm8, %v298_v58 }
 0x249   :  { %800 = vmatpush1.bf16.msra.mxu0 %v799_v57  ;;  %510 = vmatprep.mubr.f32.mxu0 %v886_v1 }
 0x24a   :  { %802 = vmatprep.subr.bf16.mxu0 %v801_v59 }
 0x24d   :  { %804 = vmatpush1.bf16.msra.mxu0 %v803_v2 }
 0x24e   :  { %806 = vmatprep.subr.bf16.mxu0 %v805_v3 }
 0x251   :  { %808 = vmatpush1.bf16.msra.mxu0 %v807_v9 }
 0x252   :  { %810 = vmatprep.subr.bf16.mxu0 %v809_v10  ;;  %v836_v45 = vpop.permute.xlu1 %835 }
 0x253   :  { %v837_v51 = vunpack.i.l.bf16 %v836_v45  ;;  %v838_v59 = vunpack.i.h.bf16 %v836_v45 }
 0x255   :  { %812 = vmatpush1.bf16.msra.mxu0 %v811_v15 }
 0x256   :  { %814 = vmatprep.subr.bf16.mxu0 %v813_v16  ;;  %v842_v52 = vpop.permute.xlu1 %841  ;;  %v554_v5 = vpop.permute.xlu0 %553 }
 0x257   :  { %v844_v62 = vunpack.i.h.bf16 %v842_v52 }
 0x259   :  { %816 = vmatpush1.bf16.msra.mxu0 %v815_v20 }
 0x25a   :  { %818 = vmatprep.subr.bf16.mxu0 %v817_v23  ;;  %v539_v12 = vpop.permute.xlu1 %538 }
 0x25d   :  { %820 = vmatpush1.bf16.msra.mxu0 %v819_v26 }
 0x313   :  { %v380_v29 = vpop.f32.mrb[0].mxu0 }
 0x314   :  { %v381_v30 = vadd.f32 %v380_v29, %v303_v28  ;;  %v749_v31 = vpop.f32.mrb[1].mxu0 }
 0x316   :  { %v394_v32 = vmax.f32 %v381_v30, 0.0 }
 0x317   :  { %v385_v33 = vpop.f32.mrb[2].mxu0 }
 0x318   :  { %v398_v34 = vsel %vm397_vm9, %v394_v32, %v997_v6  ;;  %v386_v36 = vadd.f32 %v385_v33, %v303_v28  ;;  %v752_v37 = vpop.f32.mrb[3].mxu0  ;;  %v436_v6 = vlaneseq }
 0x319   :  { %511 = vmatmul.mubr.f32.vlgmr.msra.gmra.mrb[6].mxu0 %v398_v34 }
 0x31a   :  { %v395_v38 = vmax.f32 %v386_v36, 0.0  ;;  %516 = vmatprep.mubr.f32.mxu0 %v886_v1  ;;  %v437_v44 = vshrl.u32 %v436_v6, 7 }
 0x31b   :  { %v390_v39 = vpop.f32.mrb[4].mxu0 }
 0x31c   :  { %v391_v40 = vadd.f32 %v390_v39, %v303_v28  ;;  %v755_v41 = vpop.f32.mrb[5].mxu0  ;;  %v399_v42 = vsel %vm397_vm9, %v395_v38, %v1000_v14  ;;  %v438_v46 = vsub.s32 0, %v437_v44  ;;  %v442_v48 = vsub.s32 1, %v437_v44 }
 0x31d   :  { %517 = vmatmul.mubr.f32.gmra.mrb[8].mxu0 %v399_v42  ;;  %v843_v14 = vunpack.i.l.bf16 %v842_v52 }
 0x31e   :  { %v396_v43 = vmax.f32 %v391_v40, 0.0  ;;  %522 = vmatprep.mubr.f32.mxu0 %v886_v1  ;;  %v439_v49 = vrot.slane %v434_v47, %v438_v46  ;;  %v1033_v50 = vrot.slane %v434_v47, %v442_v48 }
 0x320   :  { %v400_v35 = vsel %vm397_vm9, %v396_v43, %v1003_v19 }
 0x321   :  { %523 = vmatmul.mubr.f32.gmra.mrb[10].mxu0 %v400_v35 }
 0x3ec   :  { %v512_v53 = vpop.f32.mrb[6].mxu0 }
 0x3ed   :  { %v513_v54 = vadd.f32 %v512_v53, %v439_v49  ;;  %v514_v55 = vpop.f32.mrb[7].mxu0 }
 0x3ee   :  { %v515_v1 = vadd.f32 %v514_v55, %v1033_v50 }
 0x3ef   :  { %v556_v56 = vmul.f32 %v837_v51, %v513_v54  ;;  %v541_v11 = vmul.f32 %v843_v14, %v513_v54 }
 0x3f0   :  { %v577_v19 = vmul.f32 %v837_v51, %v515_v1  ;;  %v518_v57 = vpop.f32.mrb[8].mxu0  ;;  %v1036_v58 = vmul.f32 %v843_v14, %v515_v1 }
 0x3f1   :  { %v519_v60 = vadd.f32 %v518_v57, %v439_v49  ;;  %v520_v61 = vpop.f32.mrb[9].mxu0  ;;  %562 = vrot.lane.b32.xlu0 %v556_v56, %s890_s9 }
 0x3f2   :  { %v521_v63 = vadd.f32 %v520_v61, %v1033_v50 }
 0x3f3   :  { %v557_v2 = vmul.f32 %v838_v59, %v519_v60  ;;  %v542_v15 = vmul.f32 %v844_v62, %v519_v60 }
 0x3f4   :  { %v578_v3 = vmul.f32 %v838_v59, %v521_v63  ;;  %v524_v4 = vpop.f32.mrb[10].mxu0  ;;  %v575_v7 = vmul.f32 %v844_v62, %v521_v63 }
 0x3f5   :  { %v525_v8 = vadd.f32 %v524_v4, %v439_v49  ;;  %v526_v9 = vpop.f32.mrb[11].mxu0  ;;  %564 = vrot.lane.b32.xlu1 %v557_v2, %s890_s9 }
 0x3f6   :  { %v527_v38 = vadd.f32 %v526_v9, %v1033_v50 }
 0x3f7   :  { %v558_v10 = vmul.f32 %v554_v5, %v525_v8  ;;  %v543_v21 = vmul.f32 %v539_v12, %v525_v8 }
 0x3f8   :  { %v579_v39 = vmul.f32 %v554_v5, %v527_v38  ;;  %v576_v51 = vmul.f32 %v539_v12, %v527_v38 }
 0x3f9   :  { %566 = vrot.lane.b32.xlu0 %v558_v10, %s890_s9 }
 0x463   :  { %v563_v13 = vpop.permute.xlu0 %562 }
 0x464   :  { %v571_v0 = vadd.f32 %v563_v13, %v541_v11 }
 0x466   :  { %v595_v16 = vsel %vm397_vm9, %v571_v0, -1e+09 }
 0x467   :  { %v565_v17 = vpop.permute.xlu1 %564  ;;  %601 = vmax.xlane.f32.xlu1 %v595_v16  ;;  %628 = vst [vmem:[%s1083_s3] sm:$0xff] %v595_v16 }
 0x468   :  { %v572_v18 = vadd.f32 %v565_v17, %v542_v15 }
 0x46a   :  { %v596_v20 = vsel %vm397_vm9, %v572_v18, -1e+09 }
 0x46b   :  { %629 = vst [vmem:[%s1083_s3 + $0x18] sm:$0xff] %v596_v20  ;;  %603 = vmax.xlane.f32.xlu0 %v596_v20  ;;  %v567_v22 = vpop.permute.xlu0 %566 }
 0x46c   :  { %v573_v23 = vadd.f32 %v567_v22, %v543_v21 }
 0x46e   :  { %v597_v24 = vsel %vm397_vm9, %v573_v23, -1e+09 }
 0x46f   :  { %605 = vmax.xlane.f32.xlu0 %v597_v24  ;;  %630 = vst [vmem:[%s1083_s3 + $0x30] sm:$0xff] %v597_v24 }
 0x4f4   :  { %v602_v25 = vpop.xlane.xlu1 %601 }
 0x4f5   :  { %v607_v26 = vsub.f32 %v595_v16, %v602_v25 }
 0x4f7   :  { %v610_v27 = vmul.f32 1.442695, %v607_v26 }
 0x4f8   :  { %v604_v28 = vpop.xlane.xlu0 %603 }
 0x4f9   :  { %845 = vpow2.f32 %v610_v27  ;;  %v608_v29 = vsub.f32 %v596_v20, %v604_v28 }
 0x4fb   :  { %v612_v30 = vmul.f32 1.442695, %v608_v29 }
 0x4fc   :  { %v606_v33 = vpop.xlane.xlu0 %605 }
 0x4fd   :  { %847 = vpow2.f32 %v612_v30  ;;  %v609_v34 = vsub.f32 %v597_v24, %v606_v33 }
 0x4ff   :  { %v614_v36 = vmul.f32 1.442695, %v609_v34 }
 0x501   :  { %849 = vpow2.f32 %v614_v36 }
 0x503   :  { %v846_v31 = vpop.eup %845 }
 0x504   :  { %616 = vadd.xlane.f32.xlu1 %v846_v31 }
 0x507   :  { %v848_v32 = vpop.eup %847 }
 0x508   :  { %618 = vadd.xlane.f32.xlu0 %v848_v32 }
 0x50b   :  { %v850_v37 = vpop.eup %849 }
 0x515   :  { %585 = vrot.lane.b32.xlu1 %v578_v3, %s890_s9 }
 0x51e   :  { %583 = vrot.lane.b32.xlu0 %v577_v19, %s890_s9 }
 0x539   :  { %620 = vadd.xlane.f32.xlu1 %v850_v37 }
 0x54a   :  { %587 = vrot.lane.b32.xlu1 %v579_v39, %s890_s9 }
 0x591   :  { %v617_v40 = vpop.xlane.xlu1 %616 }
 0x592   :  { %851 = vrcp.f32 %v617_v40 }
 0x595   :  { %v619_v41 = vpop.xlane.xlu0 %618  ;;  %v586_v42 = vpop.permute.xlu1 %585 }
 0x596   :  { %853 = vrcp.f32 %v619_v41  ;;  %v593_v43 = vadd.f32 %v586_v42, %v575_v7 }
 0x598   :  { %v599_v35 = vsel %vm397_vm9, %v593_v43, 0.0 }
 0x599   :  { %635 = vst [vmem:[%s1083_s3 + $0x28] sm:$0xff] %v599_v35  ;;  %v584_v6 = vpop.permute.xlu0 %583 }
 0x59a   :  { %v592_v44 = vadd.f32 %v584_v6, %v1036_v58 }
 0x59c   :  { %v852_v45 = vpop.eup %851  ;;  %v598_v46 = vsel %vm397_vm9, %v592_v44, 0.0 }
 0x59d   :  { %v625_v47 = vmul.f32 %v852_v45, %v846_v31  ;;  %634 = vst [vmem:[%s1083_s3 + $0x10] sm:$0xff] %v598_v46 }
 0x59f   :  { %631 = vst [vmem:[%s1083_s3 + $0x8] sm:$0xff] %v625_v47 }
 0x5a0   :  { %v854_v48 = vpop.eup %853 }
 0x5a1   :  { %v626_v49 = vmul.f32 %v854_v48, %v848_v32 }
 0x5a3   :  { %632 = vst [vmem:[%s1083_s3 + $0x20] sm:$0xff] %v626_v49 }
 0x5c6   :  { %v621_v50 = vpop.xlane.xlu1 %620 }
 0x5c7   :  { %855 = vrcp.f32 %v621_v50 }
 0x5ca   :  { %v588_v52 = vpop.permute.xlu1 %587 }
 0x5cb   :  { %v594_v14 = vadd.f32 %v588_v52, %v576_v51 }
 0x5cd   :  { %v600_v53 = vsel %vm397_vm9, %v594_v14, 0.0 }
 0x5ce   :  { %636 = vst [vmem:[%s1083_s3 + $0x40] sm:$0xff] %v600_v53 }
 0x5d1   :  { %v856_v54 = vpop.eup %855 }
 0x5d2   :  { %v627_v55 = vmul.f32 %v856_v54, %v850_v37 }
 0x5d4   :  { %633 = vst [vmem:[%s1083_s3 + $0x38] sm:$0xff] %v627_v55 }
 0x5d5   :  { %641 = vsyncpa [#allocation3], 1 }

</bundles_post_ra>
